<compile_context>
chip_gen: v6e
topology: v6e:2x2x1
jax: 0.10.0
libtpu: 0.0.40
codegen_flags: <defaults>
</compile_context>

<pallas_src>
import functools

import jax
import jax.numpy as jnp
from jax.experimental import pallas as pl
from jax.experimental.pallas import tpu as pltpu

LANES = 128       # lane width of every tile
BIAS_ROWS = 8     # sublane rows of the packed bias tile (rows 0..2 used)


# ----------------------------------------------------------------------------
# Kernel: one (TM, 128) block of agents through the fused 3-matmul MLP.
# ----------------------------------------------------------------------------
def _fused_mlp_kernel(x_ref, w1_ref, w2_ref, w3_ref, b_ref, out_ref):
    # x_ref  : (TM, 128)  each row = [sight(6) | pheromone(1) | zeros]
    # w*_ref : (128, 128) zero-padded fused weight blocks (VMEM-resident)
    # b_ref  : (8, 128)   row 0 = [b1|c1], row 1 = [b2|c2], row 2 = b3+c3
    x = x_ref[...]

    # layer 1: blockdiag(w1, v1), tanh
    h = jnp.tanh(
        jnp.dot(x, w1_ref[...], preferred_element_type=jnp.float32)
        + b_ref[0:1, :])
    # layer 2: blockdiag(w2, v2), tanh
    h = jnp.tanh(
        jnp.dot(h, w2_ref[...], preferred_element_type=jnp.float32)
        + b_ref[1:2, :])
    # layer 3: vstack(w3, v3) — this matmul also performs the x1 + x2 add
    y = (jnp.dot(h, w3_ref[...], preferred_element_type=jnp.float32)
         + b_ref[2:3, :])
    out_ref[...] = jax.nn.sigmoid(y)


# ----------------------------------------------------------------------------
# Parameter handling
# ----------------------------------------------------------------------------
def _init_linear(key, fan_in, fan_out):
    """PyTorch-default-style uniform init; weight stored transposed (in, out)."""
    kw, kb = jax.random.split(key)
    bound = 1.0 / jnp.sqrt(float(fan_in))
    w_t = jax.random.uniform(kw, (fan_in, fan_out), jnp.float32, -bound, bound)
    b = jax.random.uniform(kb, (fan_out,), jnp.float32, -bound, bound)
    return w_t, b


def make_params(seed=0):
    keys = jax.random.split(jax.random.PRNGKey(seed), 6)
    w1, b1 = _init_linear(keys[0], 6, 12)
    w2, b2 = _init_linear(keys[1], 12, 6)
    w3, b3 = _init_linear(keys[2], 6, 3)
    v1, c1 = _init_linear(keys[3], 1, 5)
    v2, c2 = _init_linear(keys[4], 5, 5)
    v3, c3 = _init_linear(keys[5], 5, 3)
    return dict(w1=w1, b1=b1, w2=w2, b2=b2, w3=w3, b3=b3,
                v1=v1, c1=c1, v2=v2, c2=c2, v3=v3, c3=c3)


def pack_params(params):
    """Pack/pad all weights & biases ONCE (outside the jitted forward)."""
    f32 = jnp.float32
    w1, b1 = jnp.asarray(params["w1"], f32), jnp.asarray(params["b1"], f32)
    w2, b2 = jnp.asarray(params["w2"], f32), jnp.asarray(params["b2"], f32)
    w3, b3 = jnp.asarray(params["w3"], f32), jnp.asarray(params["b3"], f32)
    v1, c1 = jnp.asarray(params["v1"], f32), jnp.asarray(params["c1"], f32)
    v2, c2 = jnp.asarray(params["v2"], f32), jnp.asarray(params["c2"], f32)
    v3, c3 = jnp.asarray(params["v3"], f32), jnp.asarray(params["c3"], f32)

    # layer 1 blockdiag: in = [sight(6) | pheromone(1)] -> [x1(12) | x2(5)]
    w1blk = jnp.zeros((LANES, LANES), f32)
    w1blk = w1blk.at[0:6, 0:12].set(w1)
    w1blk = w1blk.at[6:7, 12:17].set(v1)
    # layer 2 blockdiag: (17,) -> [x1(6) | x2(5)]
    w2blk = jnp.zeros((LANES, LANES), f32)
    w2blk = w2blk.at[0:12, 0:6].set(w2)
    w2blk = w2blk.at[12:17, 6:11].set(v2)
    # layer 3 vstack: (11,) -> (3,)  — performs x1 + x2 in the contraction
    w3blk = jnp.zeros((LANES, LANES), f32)
    w3blk = w3blk.at[0:6, 0:3].set(w3)
    w3blk = w3blk.at[6:11, 0:3].set(v3)

    bstack = jnp.zeros((BIAS_ROWS, LANES), f32)
    bstack = bstack.at[0, 0:12].set(b1).at[0, 12:17].set(c1)
    bstack = bstack.at[1, 0:6].set(b2).at[1, 6:11].set(c2)
    bstack = bstack.at[2, 0:3].set(b3 + c3)          # fold the x1 + x2 bias
    return w1blk, w2blk, w3blk, bstack


# ----------------------------------------------------------------------------
# Forward
# ----------------------------------------------------------------------------
@functools.partial(jax.jit, static_argnames=("tm",))
def neural_network_forward_batched(sight, pheromone, w1blk, w2blk, w3blk,
                                   bstack, *, tm=128):
    """Batched forward: sight (B, ...) with 6 elems/agent, pheromone (B, 1)."""
    b = sight.shape[0]
    s = jnp.reshape(sight, (b, -1)).astype(jnp.float32)       # (B, 6)
    p = jnp.reshape(pheromone, (b, -1)).astype(jnp.float32)   # (B, 1)
    row = jnp.concatenate([s, p], axis=-1)                    # (B, 7)

    n_blocks = pl.cdiv(b, tm)
    b_pad = n_blocks * tm
    x = jnp.zeros((b_pad, LANES), jnp.float32).at[:b, :row.shape[1]].set(row)

    const = lambda i: (0, 0)   # weights/biases: same block every step -> one DMA
    out_pad = pl.pallas_call(
        _fused_mlp_kernel,
        out_shape=jax.ShapeDtypeStruct((b_pad, LANES), jnp.float32),
        grid=(n_blocks,),
        in_specs=[
            pl.BlockSpec((tm, LANES), lambda i: (i, 0)),       # agent rows
            pl.BlockSpec((LANES, LANES), const),               # W1blk (resident)
            pl.BlockSpec((LANES, LANES), const),               # W2blk (resident)
            pl.BlockSpec((LANES, LANES), const),               # W3sum (resident)
            pl.BlockSpec((BIAS_ROWS, LANES), const),           # biases (resident)
        ],
        out_specs=pl.BlockSpec((tm, LANES), lambda i: (i, 0)),
        compiler_params=pltpu.CompilerParams(
            dimension_semantics=("parallel",)),                # v7x: both TCs
    )(x, w1blk, w2blk, w3blk, bstack)

    return out_pad[:b, :3]                                     # (B, 3)


def neural_network_forward(sight, pheromone, w1blk, w2blk, w3blk, bstack):
    """Single-agent forward matching the PyTorch module (Flatten(0,-1))."""
    s = jnp.reshape(sight, (1, -1))
    p = jnp.reshape(pheromone, (1, -1))
    return neural_network_forward_batched(
        s, p, w1blk, w2blk, w3blk, bstack, tm=8)[0]            # (3,)


# ----------------------------------------------------------------------------
# Pure-JAX reference (mirrors the PyTorch module)
# ----------------------------------------------------------------------------
def _reference_forward_batched(sight, pheromone, params):
    b = sight.shape[0]
    s = jnp.reshape(sight, (b, -1)).astype(jnp.float32)
    p = jnp.reshape(pheromone, (b, -1)).astype(jnp.float32)
    x1 = jnp.tanh(s @ params["w1"] + params["b1"])
    x1 = jnp.tanh(x1 @ params["w2"] + params["b2"])
    x1 = x1 @ params["w3"] + params["b3"]
    x2 = jnp.tanh(p @ params["v1"] + params["c1"])
    x2 = jnp.tanh(x2 @ params["v2"] + params["c2"])
    x2 = x2 @ params["v3"] + params["c3"]
    return jax.nn.sigmoid(x1 + x2)


if __name__ == "__main__":
    key = jax.random.PRNGKey(0)
    k_s, k_p = jax.random.split(key)

    # 300 agents (non-multiple of the 128-row block -> exercises padding and a
    # 3-step grid). Each agent: sight with 6 elements, pheromone with 1.
    B = 300
    sight = jax.random.normal(k_s, (B, 2, 3), jnp.float32)
    pheromone = jax.random.normal(k_p, (B, 1), jnp.float32)

    params = make_params(seed=0)
    packed = pack_params(params)                      # one-time packing/padding
    packed = tuple(jax.block_until_ready(t) for t in packed)

    # Batched path (the performance path).
    out = neural_network_forward_batched(sight, pheromone, *packed, tm=128)
    out = jax.block_until_ready(out)
    ref = _reference_forward_batched(sight, pheromone, params)
    assert out.shape == (B, 3)
    assert jnp.allclose(out, ref, atol=1e-5, rtol=1e-5), (
        float(jnp.max(jnp.abs(out - ref))))

    # Single-agent path (matches the PyTorch module's forward signature).
    out1 = neural_network_forward(sight[0], pheromone[0], *packed)
    out1 = jax.block_until_ready(out1)
    ref1 = _reference_forward_batched(sight[:1], pheromone[:1], params)[0]
    assert out1.shape == (3,)
    assert jnp.allclose(out1, ref1, atol=1e-5, rtol=1e-5), (out1, ref1)

    print("KERNEL_OK")
</pallas_src>

<mosaic_0001>
module attributes {stable_mosaic.version = 11 : i64} {
  func.func @_fused_mlp_kernel(%arg0: i32, %arg1: memref<128x128xf32, #tpu.memory_space<vmem>>, %arg2: memref<128x128xf32, #tpu.memory_space<vmem>>, %arg3: memref<128x128xf32, #tpu.memory_space<vmem>>, %arg4: memref<128x128xf32, #tpu.memory_space<vmem>>, %arg5: memref<8x128xf32, #tpu.memory_space<vmem>>, %arg6: memref<128x128xf32, #tpu.memory_space<vmem>>) attributes {dimension_semantics = [#tpu.dimension_semantics<parallel>], iteration_bounds = array<i64: 3>, scalar_prefetch = 0 : i64, scratch_operands = 0 : i64, tpu.core_type = #tpu.core_type<tc>, window_params = [{transform_indices = @transform_0, window_bounds = array<i64: 128, 128>}, {pipeline_mode = #tpu.pipeline_mode<synchronous>, transform_indices = @transform_1, window_bounds = array<i64: 128, 128>}, {pipeline_mode = #tpu.pipeline_mode<synchronous>, transform_indices = @transform_2, window_bounds = array<i64: 128, 128>}, {pipeline_mode = #tpu.pipeline_mode<synchronous>, transform_indices = @transform_3, window_bounds = array<i64: 128, 128>}, {pipeline_mode = #tpu.pipeline_mode<synchronous>, transform_indices = @transform_4, window_bounds = array<i64: 8, 128>}, {transform_indices = @transform_5, window_bounds = array<i64: 128, 128>}]} {
    %c0 = arith.constant 0 : index
    %c0_0 = arith.constant 0 : index
    %0 = vector.load %arg1[%c0, %c0_0] : memref<128x128xf32, #tpu.memory_space<vmem>>, vector<128x128xf32>
    %c0_1 = arith.constant 0 : index
    %c0_2 = arith.constant 0 : index
    %1 = vector.load %arg2[%c0_1, %c0_2] : memref<128x128xf32, #tpu.memory_space<vmem>>, vector<128x128xf32>
    %cst = arith.constant dense<0.000000e+00> : vector<128x128xf32>
    %2 = tpu.matmul %0, %1, %cst {dimension_numbers = #tpu.dot_dimension_numbers<[1], [0], [0], [1], [0, 0, 1, 1], [], []>} : vector<128x128xf32>, vector<128x128xf32>, vector<128x128xf32> -> vector<128x128xf32>
    %c0_3 = arith.constant 0 : index
    %c0_4 = arith.constant 0 : index
    %3 = vector.load %arg5[%c0_3, %c0_4] : memref<8x128xf32, #tpu.memory_space<vmem>>, vector<1x128xf32>
    %4 = vector.broadcast %3 : vector<1x128xf32> to vector<128x128xf32>
    %5 = arith.addf %2, %4 : vector<128x128xf32>
    %6 = math.tanh %5 : vector<128x128xf32>
    %c0_5 = arith.constant 0 : index
    %c0_6 = arith.constant 0 : index
    %7 = vector.load %arg3[%c0_5, %c0_6] : memref<128x128xf32, #tpu.memory_space<vmem>>, vector<128x128xf32>
    %cst_7 = arith.constant dense<0.000000e+00> : vector<128x128xf32>
    %8 = tpu.matmul %6, %7, %cst_7 {dimension_numbers = #tpu.dot_dimension_numbers<[1], [0], [0], [1], [0, 0, 1, 1], [], []>} : vector<128x128xf32>, vector<128x128xf32>, vector<128x128xf32> -> vector<128x128xf32>
    %c1 = arith.constant 1 : index
    %c0_8 = arith.constant 0 : index
    %9 = vector.load %arg5[%c1, %c0_8] : memref<8x128xf32, #tpu.memory_space<vmem>>, vector<1x128xf32>
    %10 = vector.broadcast %9 : vector<1x128xf32> to vector<128x128xf32>
    %11 = arith.addf %8, %10 : vector<128x128xf32>
    %12 = math.tanh %11 : vector<128x128xf32>
    %c0_9 = arith.constant 0 : index
    %c0_10 = arith.constant 0 : index
    %13 = vector.load %arg4[%c0_9, %c0_10] : memref<128x128xf32, #tpu.memory_space<vmem>>, vector<128x128xf32>
    %cst_11 = arith.constant dense<0.000000e+00> : vector<128x128xf32>
    %14 = tpu.matmul %12, %13, %cst_11 {dimension_numbers = #tpu.dot_dimension_numbers<[1], [0], [0], [1], [0, 0, 1, 1], [], []>} : vector<128x128xf32>, vector<128x128xf32>, vector<128x128xf32> -> vector<128x128xf32>
    %c2 = arith.constant 2 : index
    %c0_12 = arith.constant 0 : index
    %15 = vector.load %arg5[%c2, %c0_12] : memref<8x128xf32, #tpu.memory_space<vmem>>, vector<1x128xf32>
    %16 = vector.broadcast %15 : vector<1x128xf32> to vector<128x128xf32>
    %17 = arith.addf %14, %16 : vector<128x128xf32>
    %18 = arith.negf %17 : vector<128x128xf32>
    %19 = math.exp %18 : vector<128x128xf32>
    %cst_13 = arith.constant 1.000000e+00 : f32
    %20 = vector.broadcast %cst_13 : f32 to vector<128x128xf32>
    %21 = arith.addf %20, %19 : vector<128x128xf32>
    %22 = arith.divf %20, %21 : vector<128x128xf32>
    %c0_14 = arith.constant 0 : index
    %c0_15 = arith.constant 0 : index
    %23 = vector.load %arg6[%c0_14, %c0_15] : memref<128x128xf32, #tpu.memory_space<vmem>>, vector<128x128xf32>
    tpu.vector_store %arg6[%c0_14, %c0_15], %22 {strides = array<i32>} : memref<128x128xf32, #tpu.memory_space<vmem>>, vector<128x128xf32>,
    return
  }
  func.func @transform_0(%arg0: i32) -> (i32, i32) {
    %c0_i32 = arith.constant 0 : i32
    %c0_i32_0 = arith.constant 0 : i32
    return %arg0, %c0_i32 : i32, i32
  }
  func.func @transform_1(%arg0: i32) -> (i32, i32) {
    %c0_i32 = arith.constant 0 : i32
    %c0_i32_0 = arith.constant 0 : i32
    %c0_i32_1 = arith.constant 0 : i32
    return %c0_i32, %c0_i32_0 : i32, i32
  }
  func.func @transform_2(%arg0: i32) -> (i32, i32) {
    %c0_i32 = arith.constant 0 : i32
    %c0_i32_0 = arith.constant 0 : i32
    %c0_i32_1 = arith.constant 0 : i32
    return %c0_i32, %c0_i32_0 : i32, i32
  }
  func.func @transform_3(%arg0: i32) -> (i32, i32) {
    %c0_i32 = arith.constant 0 : i32
    %c0_i32_0 = arith.constant 0 : i32
    %c0_i32_1 = arith.constant 0 : i32
    return %c0_i32, %c0_i32_0 : i32, i32
  }
  func.func @transform_4(%arg0: i32) -> (i32, i32) {
    %c0_i32 = arith.constant 0 : i32
    %c0_i32_0 = arith.constant 0 : i32
    %c0_i32_1 = arith.constant 0 : i32
    return %c0_i32, %c0_i32_0 : i32, i32
  }
  func.func @transform_5(%arg0: i32) -> (i32, i32) {
    %c0_i32 = arith.constant 0 : i32
    %c0_i32_0 = arith.constant 0 : i32
    return %arg0, %c0_i32 : i32, i32
  }
}

</mosaic_0001>

<bundles_post_ra>
// kernel: neural_network_forward_batched.1
= control target key start
LH: loop header
LB: loop body
LE: loop exit
PB: predicated region body
PF: predicated region fallthrough
CT: control target
= control target key end

     0   :  { %s1442_s18 = smov 0   ;;  %s1709_s0 = inlined_call_operand.vmem [shape: f32[384,128], index: 0, kind: input, shape index: {}]   ;;  %s1710_s1 = inlined_call_operand.vmem [shape: f32[128,128], index: 1, kind: input, shape index: {}]   ;;  %s1711_s2 = inlined_call_operand.vmem [shape: f32[128,128], index: 2, kind: input, shape index: {}]   ;;  %s1712_s3 = inlined_call_operand.vmem [shape: f32[128,128], index: 3, kind: input, shape index: {}]   ;;  %s1713_s4 = inlined_call_operand.vmem [shape: f32[8,128], index: 4, kind: input, shape index: {}]   ;;  %s1714_s5 = inlined_call_operand.vmem [shape: f32[384,128], index: 5, kind: output, shape index: {}]  }
   0x1 LB: > { %s942_s19 = sadd.s32 4294967295, %s1410_s18   ;;  %p946_p0 = scmp.ge.s32.totalorder %s1410_s18, 1  ;;  %s1410_s18 = sphi %s1442_s18, %s15_s18  }
   0x2   : > { %p188_p1 = scmp.lt.s32.totalorder %s1410_s18, 4 }
   0x4   : > { %p189_p2 = pnand %p946_p0, %p188_p1 }
   0x5   : > { %s947_s24 = sshll.u32 (!%p189_p2), %s942_s19, 4 }
   0x6   : > { %192 = sbr.rel (%p189_p2) target bundleno = 727 (0x2d7), region = 40  ;;  %p217_p3 = scmp.lt.s32.totalorder (!%p189_p2), %s947_s24, 47 }
   0xb   : > { %v259_v0 = vld [vmem:[%s1710_s1 + $0x78] sm:$0xff]  ;;  %v258_v1 = vld [vmem:[%s1710_s1 + $0x70] sm:$0xff]  ;;  %v257_v2 = vld [vmem:[%s1710_s1 + $0x68] sm:$0xff]  ;;  %s1716_s24 = smov (!%p217_p3, %s947_s24), 47 }
   0xc   : > { %1068 = vmatprep.subr.mxu0 %v259_v0  ;;  %v256_v3 = vld [vmem:[%s1710_s1 + $0x60] sm:$0xff]  ;;  %s948_s29 = sshll.u32 %s1716_s24, 3  ;;  %v441_v4 = vld [vmem:[%s1711_s2 + $0x78] sm:$0xff]  ;;  %v440_v6 = vld [vmem:[%s1711_s2 + $0x70] sm:$0xff] }
   0xd   : > { %1069 = vmatpush3.msra.mxu0 %v259_v0  ;;  %v255_v5 = vld [vmem:[%s1710_s1 + $0x58] sm:$0xff]  ;;  %s1476_s11 = scalar_lea.vmem %s1709_s0, %s948_s29  ;;  %1124 = vmatprep.subr.mxu1 %v441_v4  ;;  %v254_v8 = vld [vmem:[%s1710_s1 + $0x50] sm:$0xff]  ;;  %v439_v9 = vld [vmem:[%s1711_s2 + $0x68] sm:$0xff]  ;;  %s1688_s17 = scalar_lea.vmem %s1714_s5, %s948_s29 }
   0xe   : > { %1070 = vmatprep.subr.mxu0 %v258_v1  ;;  %v228_v7 = vld [vmem:[%s1476_s11] sm:$0xff]  ;;  %1125 = vmatpush3.msra.mxu1 %v441_v4  ;;  %v253_v10 = vld [vmem:[%s1710_s1 + $0x48] sm:$0xff]  ;;  %v437_v13 = vld [vmem:[%s1711_s2 + $0x58] sm:$0xff] }
   0xf   : > { %1071 = vmatpush3.msra.mxu0 %v258_v1  ;;  %1100 = vmatprep.mubr.f32.mxu0 %v228_v7  ;;  %v438_v11 = vld [vmem:[%s1711_s2 + $0x60] sm:$0xff]  ;;  %v251_v14 = vld [vmem:[%s1710_s1 + $0x38] sm:$0xff]  ;;  %v436_v15 = vld [vmem:[%s1711_s2 + $0x50] sm:$0xff] }
  0x10   : > { %1072 = vmatprep.subr.mxu0 %v257_v2  ;;  %1126 = vmatprep.subr.mxu1 %v440_v6  ;;  %v252_v12 = vld [vmem:[%s1710_s1 + $0x40] sm:$0xff]  ;;  %v250_v16 = vld [vmem:[%s1710_s1 + $0x30] sm:$0xff]  ;;  %v249_v17 = vld [vmem:[%s1710_s1 + $0x28] sm:$0xff] }
  0x11   : > { %1073 = vmatpush3.msra.mxu0 %v257_v2  ;;  %1127 = vmatpush3.msra.mxu1 %v440_v6  ;;  %v248_v18 = vld [vmem:[%s1710_s1 + $0x20] sm:$0xff]  ;;  %v247_v19 = vld [vmem:[%s1710_s1 + $0x18] sm:$0xff]  ;;  %v246_v20 = vld [vmem:[%s1710_s1 + $0x10] sm:$0xff] }
  0x12   : > { %1074 = vmatprep.subr.mxu0 %v256_v3  ;;  %1128 = vmatprep.subr.mxu1 %v439_v9  ;;  %v245_v21 = vld [vmem:[%s1710_s1 + $0x8] sm:$0xff]  ;;  %v244_v22 = vld [vmem:[%s1710_s1] sm:$0xff]  ;;  %v230_v24 = vld [vmem:[%s1476_s11 + $0x10] sm:$0xff] }
  0x13   : > { %1075 = vmatpush3.msra.mxu0 %v256_v3  ;;  %1129 = vmatpush3.msra.mxu1 %v439_v9  ;;  %v229_v23 = vld [vmem:[%s1476_s11 + $0x8] sm:$0xff]  ;;  %v231_v25 = vld [vmem:[%s1476_s11 + $0x18] sm:$0xff]  ;;  %v232_v26 = vld [vmem:[%s1476_s11 + $0x20] sm:$0xff] }
  0x14   : > { %1076 = vmatprep.subr.mxu0 %v255_v5  ;;  %1130 = vmatprep.subr.mxu1 %v438_v11  ;;  %v233_v27 = vld [vmem:[%s1476_s11 + $0x28] sm:$0xff]  ;;  %v234_v28 = vld [vmem:[%s1476_s11 + $0x30] sm:$0xff]  ;;  %v235_v29 = vld [vmem:[%s1476_s11 + $0x38] sm:$0xff] }
  0x15   : > { %1077 = vmatpush3.msra.mxu0 %v255_v5  ;;  %1131 = vmatpush3.msra.mxu1 %v438_v11  ;;  %v236_v30 = vld [vmem:[%s1476_s11 + $0x40] sm:$0xff]  ;;  %v237_v31 = vld [vmem:[%s1476_s11 + $0x48] sm:$0xff]  ;;  %v238_v32 = vld [vmem:[%s1476_s11 + $0x50] sm:$0xff] }
  0x16   : > { %1078 = vmatprep.subr.mxu0 %v254_v8  ;;  %1132 = vmatprep.subr.mxu1 %v437_v13  ;;  %v239_v33 = vld [vmem:[%s1476_s11 + $0x58] sm:$0xff]  ;;  %v240_v34 = vld [vmem:[%s1476_s11 + $0x60] sm:$0xff]  ;;  %v241_v35 = vld [vmem:[%s1476_s11 + $0x68] sm:$0xff] }
  0x17   : > { %1079 = vmatpush3.msra.mxu0 %v254_v8  ;;  %1133 = vmatpush3.msra.mxu1 %v437_v13  ;;  %v242_v36 = vld [vmem:[%s1476_s11 + $0x70] sm:$0xff]  ;;  %v243_v37 = vld [vmem:[%s1476_s11 + $0x78] sm:$0xff]  ;;  %v435_v38 = vld [vmem:[%s1711_s2 + $0x48] sm:$0xff] }
  0x18   : > { %1080 = vmatprep.subr.mxu0 %v253_v10  ;;  %1134 = vmatprep.subr.mxu1 %v436_v15  ;;  %v434_v39 = vld [vmem:[%s1711_s2 + $0x40] sm:$0xff]  ;;  %v433_v40 = vld [vmem:[%s1711_s2 + $0x38] sm:$0xff]  ;;  %v432_v41 = vld [vmem:[%s1711_s2 + $0x30] sm:$0xff] }
  0x19   : > { %1081 = vmatpush3.msra.mxu0 %v253_v10  ;;  %1135 = vmatpush3.msra.mxu1 %v436_v15  ;;  %v431_v42 = vld [vmem:[%s1711_s2 + $0x28] sm:$0xff]  ;;  %v430_v43 = vld [vmem:[%s1711_s2 + $0x20] sm:$0xff]  ;;  %v429_v44 = vld [vmem:[%s1711_s2 + $0x18] sm:$0xff] }
  0x1a   : > { %1082 = vmatprep.subr.mxu0 %v252_v12  ;;  %1136 = vmatprep.subr.mxu1 %v435_v38  ;;  %v428_v45 = vld [vmem:[%s1711_s2 + $0x10] sm:$0xff]  ;;  %v427_v46 = vld [vmem:[%s1711_s2 + $0x8] sm:$0xff]  ;;  %v426_v47 = vld [vmem:[%s1711_s2] sm:$0xff] }
  0x1b   : > { %1083 = vmatpush3.msra.mxu0 %v252_v12  ;;  %1137 = vmatpush3.msra.mxu1 %v435_v38  ;;  %v623_v48 = vld [vmem:[%s1712_s3 + $0x78] sm:$0xff]  ;;  %v622_v49 = vld [vmem:[%s1712_s3 + $0x70] sm:$0xff]  ;;  %v621_v50 = vld [vmem:[%s1712_s3 + $0x68] sm:$0xff] }
  0x1c   : > { %1084 = vmatprep.subr.mxu0 %v251_v14  ;;  %1138 = vmatprep.subr.mxu1 %v434_v39  ;;  %v1584_v51 = vld [vmem:[%s1712_s3 + $0x60] sm:$0xff]  ;;  %v1589_v52 = vld [vmem:[%s1712_s3 + $0x58] sm:$0xff]  ;;  %v1596_v53 = vld [vmem:[%s1712_s3 + $0x50] sm:$0xff] }
  0x1d   : > { %1085 = vmatpush3.msra.mxu0 %v251_v14  ;;  %1139 = vmatpush3.msra.mxu1 %v434_v39  ;;  %v1605_v54 = vld [vmem:[%s1713_s4] ss:$0 sm:$0xff]  ;;  %v617_v39 = vld [vmem:[%s1712_s3 + $0x48] sm:$0xff] }
  0x1e   : > { %1086 = vmatprep.subr.mxu0 %v250_v16  ;;  %1140 = vmatprep.subr.mxu1 %v433_v40 }
  0x1f   : > { %1087 = vmatpush3.msra.mxu0 %v250_v16  ;;  %1141 = vmatpush3.msra.mxu1 %v433_v40  ;;  %v616_v40 = vld [vmem:[%s1712_s3 + $0x40] sm:$0xff] }
  0x20   : > { %1088 = vmatprep.subr.mxu0 %v249_v17  ;;  %1142 = vmatprep.subr.mxu1 %v432_v41 }
  0x21   : > { %1089 = vmatpush3.msra.mxu0 %v249_v17  ;;  %1143 = vmatpush3.msra.mxu1 %v432_v41  ;;  %v615_v41 = vld [vmem:[%s1712_s3 + $0x38] sm:$0xff] }
  0x22   : > { %1090 = vmatprep.subr.mxu0 %v248_v18  ;;  %1144 = vmatprep.subr.mxu1 %v431_v42 }
  0x23   : > { %1091 = vmatpush3.msra.mxu0 %v248_v18  ;;  %1145 = vmatpush3.msra.mxu1 %v431_v42  ;;  %v614_v42 = vld [vmem:[%s1712_s3 + $0x30] sm:$0xff] }
  0x24   : > { %1092 = vmatprep.subr.mxu0 %v247_v19  ;;  %1146 = vmatprep.subr.mxu1 %v430_v43 }
  0x25   : > { %1093 = vmatpush3.msra.mxu0 %v247_v19  ;;  %1147 = vmatpush3.msra.mxu1 %v430_v43  ;;  %v613_v43 = vld [vmem:[%s1712_s3 + $0x28] sm:$0xff] }
  0x26   : > { %1094 = vmatprep.subr.mxu0 %v246_v20  ;;  %1148 = vmatprep.subr.mxu1 %v429_v44 }
  0x27   : > { %1095 = vmatpush3.msra.mxu0 %v246_v20  ;;  %1149 = vmatpush3.msra.mxu1 %v429_v44  ;;  %v612_v44 = vld [vmem:[%s1712_s3 + $0x20] sm:$0xff] }
  0x28   : > { %1096 = vmatprep.subr.mxu0 %v245_v21  ;;  %1150 = vmatprep.subr.mxu1 %v428_v45 }
  0x29   : > { %1097 = vmatpush3.msra.mxu0 %v245_v21  ;;  %1151 = vmatpush3.msra.mxu1 %v428_v45  ;;  %v611_v45 = vld [vmem:[%s1712_s3 + $0x18] sm:$0xff] }
  0x2a   : > { %1098 = vmatprep.subr.mxu0 %v244_v22  ;;  %1152 = vmatprep.subr.mxu1 %v427_v46 }
  0x2b   : > { %1099 = vmatpush3.msra.mxu0 %v244_v22  ;;  %1153 = vmatpush3.msra.mxu1 %v427_v46  ;;  %v610_v46 = vld [vmem:[%s1712_s3 + $0x10] sm:$0xff] }
  0x2c   : > { %1101 = vmatmul.mubr.f32.vlgmr.msra.gmra.mxu0 %v229_v23  ;;  %1154 = vmatprep.subr.mxu1 %v426_v47 }
  0x2d   : > { %1103 = vmatprep.mubr.f32.mxu0 %v230_v24  ;;  %1155 = vmatpush3.msra.mxu1 %v426_v47  ;;  %v609_v47 = vld [vmem:[%s1712_s3 + $0x8] sm:$0xff] }
  0x2e   : > { %1180 = vmatprep.subr.mxu0 %v623_v48  ;;  %1236 = vmatprep.subr.mxu1 %v623_v48 }
  0x2f   : > { %1181 = vmatpush3.msra.mxu0 %v623_v48 }
  0x30   : > { %1104 = vmatmul.mubr.f32.gmra.mxu0 %v231_v25  ;;  %1182 = vmatprep.subr.mxu0 %v622_v49 }
  0x31   : > { %1106 = vmatprep.mubr.f32.mxu0 %v232_v26  ;;  %1183 = vmatpush3.msra.mxu0 %v622_v49 }
  0x32   : > { %1184 = vmatprep.subr.mxu0 %v621_v50 }
  0x33   : > { %1185 = vmatpush3.msra.mxu0 %v621_v50 }
  0x34   : > { %1107 = vmatmul.mubr.f32.gmra.mxu0 %v233_v27  ;;  %1186 = vmatprep.subr.mxu0 %v1584_v51 }
  0x35   : > { %1109 = vmatprep.mubr.f32.mxu0 %v234_v28  ;;  %1187 = vmatpush3.msra.mxu0 %v1584_v51 }
  0x36   : > { %1188 = vmatprep.subr.mxu0 %v1589_v52 }
  0x37   : > { %1189 = vmatpush3.msra.mxu0 %v1589_v52 }
  0x38   : > { %1110 = vmatmul.mubr.f32.gmra.mxu0 %v235_v29  ;;  %1190 = vmatprep.subr.mxu0 %v1596_v53 }
  0x39   : > { %1112 = vmatprep.mubr.f32.mxu0 %v236_v30  ;;  %1191 = vmatpush3.msra.mxu0 %v1596_v53 }
  0x3a   : > { %1192 = vmatprep.subr.mxu0 %v617_v39 }
  0x3b   : > { %1193 = vmatpush3.msra.mxu0 %v617_v39 }
  0x3c   : > { %1113 = vmatmul.mubr.f32.gmra.mxu0 %v237_v31  ;;  %1194 = vmatprep.subr.mxu0 %v616_v40 }
  0x3d   : > { %1115 = vmatprep.mubr.f32.mxu0 %v238_v32  ;;  %1195 = vmatpush3.msra.mxu0 %v616_v40 }
  0x3e   : > { %1196 = vmatprep.subr.mxu0 %v615_v41 }
  0x3f   : > { %1197 = vmatpush3.msra.mxu0 %v615_v41 }
  0x40   : > { %1116 = vmatmul.mubr.f32.gmra.mxu0 %v239_v33  ;;  %1198 = vmatprep.subr.mxu0 %v614_v42 }
  0x41   : > { %1118 = vmatprep.mubr.f32.mxu0 %v240_v34  ;;  %1199 = vmatpush3.msra.mxu0 %v614_v42 }
  0x42   : > { %1200 = vmatprep.subr.mxu0 %v613_v43 }
  0x43   : > { %1201 = vmatpush3.msra.mxu0 %v613_v43 }
  0x44   : > { %1119 = vmatmul.mubr.f32.gmra.mxu0 %v241_v35  ;;  %1202 = vmatprep.subr.mxu0 %v612_v44 }
  0x45   : > { %1121 = vmatprep.mubr.f32.mxu0 %v242_v36  ;;  %1203 = vmatpush3.msra.mxu0 %v612_v44 }
  0x46   : > { %1204 = vmatprep.subr.mxu0 %v611_v45 }
  0x47   : > { %1205 = vmatpush3.msra.mxu0 %v611_v45 }
  0x48   : > { %1122 = vmatmul.mubr.f32.gmra.mxu0 %v243_v37  ;;  %1206 = vmatprep.subr.mxu0 %v610_v46 }
  0x49   : > { %1207 = vmatpush3.msra.mxu0 %v610_v46 }
  0x4a   : > { %1208 = vmatprep.subr.mxu0 %v609_v47 }
  0x4b   : > { %1209 = vmatpush3.msra.mxu0 %v609_v47 }
  0xec   : > { %v1102_v55 = vpop.f32.mrf.mxu0 }
  0xed   : > { %v337_v56 = vadd.f32 %v1102_v55, %v1605_v54 }
  0xee   : > { %v331_v57 = vpop.f32.mrf.mxu0 }
  0xef   : > { %v332_v58 = vadd.f32 %v1605_v54, %v331_v57 }
  0xf0   : > { %v1105_v59 = vpop.f32.mrf.mxu0 }
  0xf1   : > { %1276 = vtanh.f32 %v332_v58  ;;  %v347_v60 = vadd.f32 %v1105_v59, %v1605_v54 }
  0xf2   : > { %1278 = vtanh.f32 %v337_v56  ;;  %v341_v61 = vpop.f32.mrf.mxu0 }
  0xf3   : > { %v342_v62 = vadd.f32 %v1605_v54, %v341_v61 }
  0xf4   : > { %v1108_v63 = vpop.f32.mrf.mxu0 }
  0xf5   : > { %1280 = vtanh.f32 %v342_v62  ;;  %v357_v0 = vadd.f32 %v1108_v63, %v1605_v54 }
  0xf6   : > { %1282 = vtanh.f32 %v347_v60  ;;  %v351_v1 = vpop.f32.mrf.mxu0 }
  0xf7   : > { %v352_v2 = vadd.f32 %v1605_v54, %v351_v1 }
  0xf8   : > { %v1111_v3 = vpop.f32.mrf.mxu0 }
  0xf9   : > { %1284 = vtanh.f32 %v352_v2  ;;  %v367_v4 = vadd.f32 %v1111_v3, %v1605_v54 }
  0xfa   : > { %1286 = vtanh.f32 %v357_v0  ;;  %v361_v5 = vpop.f32.mrf.mxu0 }
  0xfb   : > { %v362_v6 = vadd.f32 %v1605_v54, %v361_v5 }
  0xfc   : > { %v1114_v7 = vpop.f32.mrf.mxu0 }
  0xfd   : > { %1288 = vtanh.f32 %v362_v6  ;;  %v377_v9 = vadd.f32 %v1114_v7, %v1605_v54 }
  0xfe   : > { %v1277_v8 = vpop.eup %1276  ;;  %1290 = vtanh.f32 %v367_v4  ;;  %v371_v10 = vpop.f32.mrf.mxu0 }
  0xff   : > { %v1279_v11 = vpop.eup %1278  ;;  %v372_v12 = vadd.f32 %v1605_v54, %v371_v10  ;;  %1156 = vmatprep.mubr.f32.mxu1 %v1277_v8 }
 0x100   : > { %v1117_v13 = vpop.f32.mrf.mxu0  ;;  %1157 = vmatmul.mubr.f32.vlgmr.msra.gmra.mxu1 %v1279_v11 }
 0x101   : > { %1292 = vtanh.f32 %v372_v12  ;;  %1252 = vmatpush3.msra.mxu1 %v623_v48  ;;  %v387_v15 = vadd.f32 %v1117_v13, %v1605_v54  ;;  %v608_v48 = vld [vmem:[%s1712_s3] sm:$0xff] }
 0x102   : > { %v1281_v14 = vpop.eup %1280  ;;  %1294 = vtanh.f32 %v377_v9  ;;  %v381_v16 = vpop.f32.mrf.mxu0  ;;  %1237 = vmatprep.subr.mxu1 %v622_v49  ;;  %1210 = vmatprep.subr.mxu0 %v608_v48 }
 0x103   : > { %v1283_v17 = vpop.eup %1282  ;;  %v382_v18 = vadd.f32 %v1605_v54, %v381_v16  ;;  %1159 = vmatprep.mubr.f32.mxu1 %v1281_v14  ;;  %1253 = vmatpush3.msra.mxu1 %v622_v49  ;;  %v952_v49 = vld [vmem:[%s1713_s4 + $0x1] ss:$0 sm:$0xff] }
 0x104   : > { %v1120_v19 = vpop.f32.mrf.mxu0  ;;  %1160 = vmatmul.mubr.f32.gmra.mxu1 %v1283_v17  ;;  %1238 = vmatprep.subr.mxu1 %v621_v50 }
 0x105   : > { %1296 = vtanh.f32 %v382_v18  ;;  %1254 = vmatpush3.msra.mxu1 %v621_v50  ;;  %v397_v21 = vadd.f32 %v1120_v19, %v1605_v54  ;;  %1211 = vmatpush3.msra.mxu0 %v608_v48 }
 0x106   : > { %v1285_v20 = vpop.eup %1284  ;;  %1298 = vtanh.f32 %v387_v15  ;;  %v391_v22 = vpop.f32.mrf.mxu0  ;;  %1239 = vmatprep.subr.mxu1 %v1584_v51 }
 0x107   : > { %v1287_v23 = vpop.eup %1286  ;;  %v392_v24 = vadd.f32 %v1605_v54, %v391_v22  ;;  %1162 = vmatprep.mubr.f32.mxu1 %v1285_v20  ;;  %1255 = vmatpush3.msra.mxu1 %v1584_v51 }
 0x108   : > { %v1123_v25 = vpop.f32.mrf.mxu0  ;;  %1163 = vmatmul.mubr.f32.gmra.mxu1 %v1287_v23  ;;  %1240 = vmatprep.subr.mxu1 %v1589_v52 }
 0x109   : > { %1300 = vtanh.f32 %v392_v24  ;;  %1256 = vmatpush3.msra.mxu1 %v1589_v52  ;;  %v407_v27 = vadd.f32 %v1123_v25, %v1605_v54 }
 0x10a   : > { %v1289_v26 = vpop.eup %1288  ;;  %1302 = vtanh.f32 %v397_v21  ;;  %v401_v28 = vpop.f32.mrf.mxu0  ;;  %1241 = vmatprep.subr.mxu1 %v1596_v53 }
 0x10b   : > { %v1291_v29 = vpop.eup %1290  ;;  %v402_v30 = vadd.f32 %v1605_v54, %v401_v28  ;;  %1165 = vmatprep.mubr.f32.mxu1 %v1289_v26  ;;  %1257 = vmatpush3.msra.mxu1 %v1596_v53 }
 0x10c   : > { %1166 = vmatmul.mubr.f32.gmra.mxu1 %v1291_v29  ;;  %1242 = vmatprep.subr.mxu1 %v617_v39 }
 0x10d   : > { %1304 = vtanh.f32 %v402_v30  ;;  %1258 = vmatpush3.msra.mxu1 %v617_v39 }
 0x10e   : > { %v1293_v31 = vpop.eup %1292  ;;  %1306 = vtanh.f32 %v407_v27  ;;  %1243 = vmatprep.subr.mxu1 %v616_v40 }
 0x10f   : > { %v1295_v32 = vpop.eup %1294  ;;  %1168 = vmatprep.mubr.f32.mxu1 %v1293_v31  ;;  %1259 = vmatpush3.msra.mxu1 %v616_v40 }
 0x110   : > { %1169 = vmatmul.mubr.f32.gmra.mxu1 %v1295_v32  ;;  %1244 = vmatprep.subr.mxu1 %v615_v41 }
 0x111   : > { %1260 = vmatpush3.msra.mxu1 %v615_v41 }
 0x112   : > { %v1297_v33 = vpop.eup %1296  ;;  %1245 = vmatprep.subr.mxu1 %v614_v42 }
 0x113   : > { %v1299_v34 = vpop.eup %1298  ;;  %1171 = vmatprep.mubr.f32.mxu1 %v1297_v33  ;;  %1261 = vmatpush3.msra.mxu1 %v614_v42 }
 0x114   : > { %1172 = vmatmul.mubr.f32.gmra.mxu1 %v1299_v34  ;;  %1246 = vmatprep.subr.mxu1 %v613_v43  ;;  %v1665_v34 = vld [vmem:[%s1713_s4 + $0x2] ss:$0 sm:$0xff] }
 0x115   : > { %1262 = vmatpush3.msra.mxu1 %v613_v43 }
 0x116   : > { %v1301_v35 = vpop.eup %1300  ;;  %1247 = vmatprep.subr.mxu1 %v612_v44 }
 0x117   : > { %v1303_v36 = vpop.eup %1302  ;;  %1174 = vmatprep.mubr.f32.mxu1 %v1301_v35  ;;  %1263 = vmatpush3.msra.mxu1 %v612_v44 }
 0x118   : > { %1175 = vmatmul.mubr.f32.gmra.mxu1 %v1303_v36  ;;  %1248 = vmatprep.subr.mxu1 %v611_v45 }
 0x119   : > { %1264 = vmatpush3.msra.mxu1 %v611_v45 }
 0x11a   : > { %v1305_v37 = vpop.eup %1304  ;;  %1249 = vmatprep.subr.mxu1 %v610_v46 }
 0x11b   : > { %v1307_v38 = vpop.eup %1306  ;;  %1177 = vmatprep.mubr.f32.mxu1 %v1305_v37  ;;  %1265 = vmatpush3.msra.mxu1 %v610_v46 }
 0x11c   : > { %1178 = vmatmul.mubr.f32.gmra.mxu1 %v1307_v38  ;;  %1250 = vmatprep.subr.mxu1 %v609_v47 }
 0x11d   : > { %1266 = vmatpush3.msra.mxu1 %v609_v47 }
 0x11e   : > { %1251 = vmatprep.subr.mxu1 %v608_v48 }
 0x11f   : > { %1267 = vmatpush3.msra.mxu1 %v608_v48 }
 0x1c0   : > { %v1158_v50 = vpop.f32.mrf.mxu1 }
 0x1c1   : > { %v519_v51 = vadd.f32 %v1158_v50, %v952_v49 }
 0x1c2   : > { %v513_v52 = vpop.f32.mrf.mxu1 }
 0x1c3   : > { %v514_v53 = vadd.f32 %v952_v49, %v513_v52 }
 0x1c4   : > { %v1161_v54 = vpop.f32.mrf.mxu1 }
 0x1c5   : > { %1308 = vtanh.f32 %v514_v53  ;;  %v529_v55 = vadd.f32 %v1161_v54, %v952_v49 }
 0x1c6   : > { %1310 = vtanh.f32 %v519_v51  ;;  %v523_v56 = vpop.f32.mrf.mxu1 }
 0x1c7   : > { %v524_v57 = vadd.f32 %v952_v49, %v523_v56 }
 0x1c8   : > { %v1164_v58 = vpop.f32.mrf.mxu1 }
 0x1c9   : > { %1312 = vtanh.f32 %v524_v57  ;;  %v539_v59 = vadd.f32 %v1164_v58, %v952_v49 }
 0x1ca   : > { %1314 = vtanh.f32 %v529_v55  ;;  %v533_v60 = vpop.f32.mrf.mxu1 }
 0x1cb   : > { %v534_v61 = vadd.f32 %v952_v49, %v533_v60 }
 0x1cc   : > { %v1167_v62 = vpop.f32.mrf.mxu1 }
 0x1cd   : > { %1316 = vtanh.f32 %v534_v61  ;;  %v549_v63 = vadd.f32 %v1167_v62, %v952_v49 }
 0x1ce   : > { %1318 = vtanh.f32 %v539_v59  ;;  %v543_v0 = vpop.f32.mrf.mxu1 }
 0x1cf   : > { %v544_v1 = vadd.f32 %v952_v49, %v543_v0 }
 0x1d0   : > { %v1170_v2 = vpop.f32.mrf.mxu1 }
 0x1d1   : > { %1320 = vtanh.f32 %v544_v1  ;;  %v559_v4 = vadd.f32 %v1170_v2, %v952_v49 }
 0x1d2   : > { %v1309_v3 = vpop.eup %1308  ;;  %1322 = vtanh.f32 %v549_v63  ;;  %v553_v5 = vpop.f32.mrf.mxu1 }
 0x1d3   : > { %v1311_v6 = vpop.eup %1310  ;;  %v554_v7 = vadd.f32 %v952_v49, %v553_v5  ;;  %1212 = vmatprep.mubr.f32.mxu0 %v1309_v3 }
 0x1d4   : > { %v1173_v8 = vpop.f32.mrf.mxu1  ;;  %1213 = vmatmul.mubr.f32.vlgmr.msra.gmra.mxu0 %v1311_v6 }
 0x1d5   : > { %1324 = vtanh.f32 %v554_v7  ;;  %v569_v10 = vadd.f32 %v1173_v8, %v952_v49 }
 0x1d6   : > { %v1313_v9 = vpop.eup %1312  ;;  %1326 = vtanh.f32 %v559_v4  ;;  %v563_v11 = vpop.f32.mrf.mxu1 }
 0x1d7   : > { %v1315_v12 = vpop.eup %1314  ;;  %v564_v13 = vadd.f32 %v952_v49, %v563_v11  ;;  %1215 = vmatprep.mubr.f32.mxu0 %v1313_v9 }
 0x1d8   : > { %v1176_v14 = vpop.f32.mrf.mxu1  ;;  %1216 = vmatmul.mubr.f32.gmra.mxu0 %v1315_v12 }
 0x1d9   : > { %1328 = vtanh.f32 %v564_v13  ;;  %v579_v16 = vadd.f32 %v1176_v14, %v952_v49 }
 0x1da   : > { %v1317_v15 = vpop.eup %1316  ;;  %1330 = vtanh.f32 %v569_v10  ;;  %v573_v17 = vpop.f32.mrf.mxu1 }
 0x1db   : > { %v1319_v18 = vpop.eup %1318  ;;  %v574_v19 = vadd.f32 %v952_v49, %v573_v17  ;;  %1218 = vmatprep.mubr.f32.mxu0 %v1317_v15 }
 0x1dc   : > { %v1179_v20 = vpop.f32.mrf.mxu1  ;;  %1219 = vmatmul.mubr.f32.gmra.mxu0 %v1319_v18 }
 0x1dd   : > { %1332 = vtanh.f32 %v574_v19  ;;  %v589_v22 = vadd.f32 %v1179_v20, %v952_v49 }
 0x1de   : > { %v1321_v21 = vpop.eup %1320  ;;  %1334 = vtanh.f32 %v579_v16  ;;  %v583_v23 = vpop.f32.mrf.mxu1 }
 0x1df   : > { %v1323_v24 = vpop.eup %1322  ;;  %v584_v25 = vadd.f32 %v952_v49, %v583_v23  ;;  %1221 = vmatprep.mubr.f32.mxu0 %v1321_v21 }
 0x1e0   : > { %1222 = vmatmul.mubr.f32.gmra.mxu0 %v1323_v24 }
 0x1e1   : > { %1336 = vtanh.f32 %v584_v25 }
 0x1e2   : > { %v1325_v26 = vpop.eup %1324  ;;  %1338 = vtanh.f32 %v589_v22 }
 0x1e3   : > { %v1327_v27 = vpop.eup %1326  ;;  %1224 = vmatprep.mubr.f32.mxu1 %v1325_v26 }
 0x1e4   : > { %1225 = vmatmul.mubr.f32.vlgmr.msra.gmra.mxu1 %v1327_v27 }
 0x1e6   : > { %v1329_v28 = vpop.eup %1328 }
 0x1e7   : > { %v1331_v29 = vpop.eup %1330  ;;  %1227 = vmatprep.mubr.f32.mxu1 %v1329_v28 }
 0x1e8   : > { %1228 = vmatmul.mubr.f32.gmra.mxu1 %v1331_v29 }
 0x1ea   : > { %v1333_v30 = vpop.eup %1332 }
 0x1eb   : > { %v1335_v31 = vpop.eup %1334  ;;  %1230 = vmatprep.mubr.f32.mxu1 %v1333_v30 }
 0x1ec   : > { %1231 = vmatmul.mubr.f32.gmra.mxu1 %v1335_v31 }
 0x1ee   : > { %v1337_v32 = vpop.eup %1336 }
 0x1ef   : > { %v1339_v33 = vpop.eup %1338  ;;  %1233 = vmatprep.mubr.f32.mxu1 %v1337_v32 }
 0x1f0   : > { %1234 = vmatmul.mubr.f32.gmra.mxu1 %v1339_v33 }
 0x294   : > { %v1214_v35 = vpop.f32.mrf.mxu0 }
 0x295   : > { %v701_v36 = vadd.f32 %v1214_v35, %v1665_v34 }
 0x296   : > { %v695_v37 = vpop.f32.mrf.mxu0 }
 0x297   : > { %v955_v38 = vmul.f32 -1.442695, %v701_v36  ;;  %v696_v39 = vadd.f32 %v1665_v34, %v695_v37 }
 0x298   : > { %v1217_v40 = vpop.f32.mrf.mxu0 }
 0x299   : > { %1340 = vpow2.f32 %v955_v38  ;;  %v954_v41 = vmul.f32 -1.442695, %v696_v39  ;;  %v711_v42 = vadd.f32 %v1217_v40, %v1665_v34 }
 0x29a   : > { %v705_v43 = vpop.f32.mrf.mxu0 }
 0x29b   : > { %1342 = vpow2.f32 %v954_v41  ;;  %v957_v44 = vmul.f32 -1.442695, %v711_v42  ;;  %v706_v45 = vadd.f32 %v1665_v34, %v705_v43 }
 0x29c   : > { %v1220_v46 = vpop.f32.mrf.mxu0 }
 0x29d   : > { %1344 = vpow2.f32 %v957_v44  ;;  %v956_v47 = vmul.f32 -1.442695, %v706_v45  ;;  %v721_v48 = vadd.f32 %v1220_v46, %v1665_v34 }
 0x29e   : > { %v715_v49 = vpop.f32.mrf.mxu0 }
 0x29f   : > { %1346 = vpow2.f32 %v956_v47  ;;  %v959_v50 = vmul.f32 -1.442695, %v721_v48  ;;  %v716_v51 = vadd.f32 %v1665_v34, %v715_v49 }
 0x2a0   : > { %v1223_v52 = vpop.f32.mrf.mxu0 }
 0x2a1   : > { %1348 = vpow2.f32 %v959_v50  ;;  %v958_v53 = vmul.f32 -1.442695, %v716_v51  ;;  %v731_v54 = vadd.f32 %v1223_v52, %v1665_v34 }
 0x2a2   : > { %v725_v55 = vpop.f32.mrf.mxu0 }
 0x2a3   : > { %1350 = vpow2.f32 %v958_v53  ;;  %v961_v56 = vmul.f32 -1.442695, %v731_v54  ;;  %v726_v57 = vadd.f32 %v1665_v34, %v725_v55 }
 0x2a4   : > { %v1226_v58 = vpop.f32.mrf.mxu1 }
 0x2a5   : > { %1352 = vpow2.f32 %v961_v56  ;;  %v960_v59 = vmul.f32 -1.442695, %v726_v57  ;;  %v741_v60 = vadd.f32 %v1226_v58, %v1665_v34 }
 0x2a6   : > { %v1341_v61 = vpop.eup %1340  ;;  %v735_v62 = vpop.f32.mrf.mxu1 }
 0x2a7   : > { %v823_v63 = vadd.f32 1.0, %v1341_v61  ;;  %1354 = vpow2.f32 %v960_v59  ;;  %v963_v0 = vmul.f32 -1.442695, %v741_v60  ;;  %v736_v1 = vadd.f32 %v1665_v34, %v735_v62 }
 0x2a8   : > { %v1343_v2 = vpop.eup %1342  ;;  %v1229_v3 = vpop.f32.mrf.mxu1 }
 0x2a9   : > { %1356 = vrcp.f32 %v823_v63  ;;  %v822_v4 = vadd.f32 1.0, %v1343_v2  ;;  %v962_v5 = vmul.f32 -1.442695, %v736_v1  ;;  %v751_v6 = vadd.f32 %v1229_v3, %v1665_v34 }
 0x2aa   : > { %v1345_v7 = vpop.eup %1344  ;;  %1358 = vpow2.f32 %v963_v0  ;;  %v745_v8 = vpop.f32.mrf.mxu1 }
 0x2ab   : > { %1360 = vrcp.f32 %v822_v4  ;;  %v825_v9 = vadd.f32 1.0, %v1345_v7  ;;  %v965_v10 = vmul.f32 -1.442695, %v751_v6  ;;  %v746_v11 = vadd.f32 %v1665_v34, %v745_v8 }
 0x2ac   : > { %v1347_v12 = vpop.eup %1346  ;;  %1362 = vpow2.f32 %v962_v5  ;;  %v1232_v13 = vpop.f32.mrf.mxu1 }
 0x2ad   : > { %1364 = vrcp.f32 %v825_v9  ;;  %v824_v14 = vadd.f32 1.0, %v1347_v12  ;;  %v964_v15 = vmul.f32 -1.442695, %v746_v11  ;;  %v761_v16 = vadd.f32 %v1232_v13, %v1665_v34 }
 0x2ae   : > { %v1349_v17 = vpop.eup %1348  ;;  %1366 = vpow2.f32 %v965_v10  ;;  %v755_v18 = vpop.f32.mrf.mxu1 }
 0x2af   : > { %1368 = vrcp.f32 %v824_v14  ;;  %v827_v19 = vadd.f32 1.0, %v1349_v17  ;;  %v967_v20 = vmul.f32 -1.442695, %v761_v16  ;;  %v756_v21 = vadd.f32 %v1665_v34, %v755_v18 }
 0x2b0   : > { %v1351_v22 = vpop.eup %1350  ;;  %1370 = vpow2.f32 %v964_v15  ;;  %v1235_v23 = vpop.f32.mrf.mxu1 }
 0x2b1   : > { %1372 = vrcp.f32 %v827_v19  ;;  %v826_v24 = vadd.f32 1.0, %v1351_v22  ;;  %v966_v25 = vmul.f32 -1.442695, %v756_v21  ;;  %v771_v26 = vadd.f32 %v1235_v23, %v1665_v34 }
 0x2b2   : > { %v1353_v27 = vpop.eup %1352  ;;  %1374 = vpow2.f32 %v967_v20  ;;  %v765_v28 = vpop.f32.mrf.mxu1 }
 0x2b3   : > { %1376 = vrcp.f32 %v826_v24  ;;  %v829_v29 = vadd.f32 1.0, %v1353_v27  ;;  %v969_v30 = vmul.f32 -1.442695, %v771_v26  ;;  %v766_v31 = vadd.f32 %v1665_v34, %v765_v28 }
 0x2b4   : > { %v1355_v32 = vpop.eup %1354  ;;  %1378 = vpow2.f32 %v966_v25 }
 0x2b5   : > { %1380 = vrcp.f32 %v829_v29  ;;  %v828_v33 = vadd.f32 1.0, %v1355_v32  ;;  %v968_v35 = vmul.f32 -1.442695, %v766_v31 }
 0x2b6   : > { %v1357_v36 = vpop.eup %1356  ;;  %1382 = vpow2.f32 %v969_v30 }
 0x2b7   : > { %v1359_v37 = vpop.eup %1358  ;;  %871 = vst [vmem:[%s1688_s17 + $0x8] sm:$0xff] %v1357_v36  ;;  %1384 = vrcp.f32 %v828_v33 }
 0x2b8   : > { %v1361_v34 = vpop.eup %1360  ;;  %v831_v38 = vadd.f32 1.0, %v1359_v37  ;;  %1386 = vpow2.f32 %v968_v35 }
 0x2b9   : > { %v1363_v39 = vpop.eup %1362  ;;  %870 = vst [vmem:[%s1688_s17] sm:$0xff] %v1361_v34 }
 0x2ba   : > { %v1365_v40 = vpop.eup %1364  ;;  %1388 = vrcp.f32 %v831_v38  ;;  %v830_v41 = vadd.f32 1.0, %v1363_v39 }
 0x2bb   : > { %v1367_v42 = vpop.eup %1366  ;;  %873 = vst [vmem:[%s1688_s17 + $0x18] sm:$0xff] %v1365_v40 }
 0x2bc   : > { %v1369_v43 = vpop.eup %1368  ;;  %1390 = vrcp.f32 %v830_v41  ;;  %v833_v44 = vadd.f32 1.0, %v1367_v42 }
 0x2bd   : > { %v1371_v45 = vpop.eup %1370  ;;  %872 = vst [vmem:[%s1688_s17 + $0x10] sm:$0xff] %v1369_v43 }
 0x2be   : > { %v1373_v46 = vpop.eup %1372  ;;  %1392 = vrcp.f32 %v833_v44  ;;  %v832_v47 = vadd.f32 1.0, %v1371_v45 }
 0x2bf   : > { %v1375_v48 = vpop.eup %1374  ;;  %875 = vst [vmem:[%s1688_s17 + $0x28] sm:$0xff] %v1373_v46 }
 0x2c0   : > { %v1377_v49 = vpop.eup %1376  ;;  %1394 = vrcp.f32 %v832_v47  ;;  %v835_v50 = vadd.f32 1.0, %v1375_v48 }
 0x2c1   : > { %v1379_v51 = vpop.eup %1378  ;;  %874 = vst [vmem:[%s1688_s17 + $0x20] sm:$0xff] %v1377_v49 }
 0x2c2   : > { %v1381_v52 = vpop.eup %1380  ;;  %1396 = vrcp.f32 %v835_v50  ;;  %v834_v53 = vadd.f32 1.0, %v1379_v51 }
 0x2c3   : > { %v1383_v54 = vpop.eup %1382  ;;  %877 = vst [vmem:[%s1688_s17 + $0x38] sm:$0xff] %v1381_v52 }
 0x2c4   : > { %v1385_v55 = vpop.eup %1384  ;;  %1398 = vrcp.f32 %v834_v53  ;;  %v837_v56 = vadd.f32 1.0, %v1383_v54 }
 0x2c5   : > { %v1387_v57 = vpop.eup %1386  ;;  %876 = vst [vmem:[%s1688_s17 + $0x30] sm:$0xff] %v1385_v55 }
 0x2c6   : > { %1400 = vrcp.f32 %v837_v56  ;;  %v836_v58 = vadd.f32 1.0, %v1387_v57 }
 0x2c7   : > { %v1389_v59 = vpop.eup %1388 }
 0x2c8   : > { %879 = vst [vmem:[%s1688_s17 + $0x48] sm:$0xff] %v1389_v59  ;;  %1402 = vrcp.f32 %v836_v58 }
 0x2c9   : > { %v1391_v60 = vpop.eup %1390 }
 0x2ca   : > { %878 = vst [vmem:[%s1688_s17 + $0x40] sm:$0xff] %v1391_v60 }
 0x2cb   : > { %v1393_v61 = vpop.eup %1392 }
 0x2cc   : > { %881 = vst [vmem:[%s1688_s17 + $0x58] sm:$0xff] %v1393_v61 }
 0x2cd   : > { %v1395_v62 = vpop.eup %1394 }
 0x2ce   : > { %880 = vst [vmem:[%s1688_s17 + $0x50] sm:$0xff] %v1395_v62 }
 0x2cf   : > { %v1397_v63 = vpop.eup %1396 }
 0x2d0   : > { %883 = vst [vmem:[%s1688_s17 + $0x68] sm:$0xff] %v1397_v63 }
 0x2d1   : > { %v1399_v0 = vpop.eup %1398 }
 0x2d2   : > { %882 = vst [vmem:[%s1688_s17 + $0x60] sm:$0xff] %v1399_v0 }
 0x2d3   : > { %v1401_v1 = vpop.eup %1400 }
 0x2d4   : > { %885 = vst [vmem:[%s1688_s17 + $0x78] sm:$0xff] %v1401_v1 }
 0x2d5   : > { %v1403_v2 = vpop.eup %1402 }
 0x2d6   : > { %884 = vst [vmem:[%s1688_s17 + $0x70] sm:$0xff] %v1403_v2 }
 0x2d7 PF: > { %s15_s18 = sadd.s32 1, %s1410_s18  }
 0x2d8   : > { %p12_p4 = scmp.ge.s32.totalorder %s15_s18, 5  }
 0x2da   :  { %14 = sbr.rel (!%p12_p4) target bundleno = 1 (0x1), region = 70 }

</bundles_post_ra>
